<compile_context>
chip_gen: v7x
topology: tpu7x:2x2x1
jax: 0.10.0
libtpu: 0.0.40
codegen_flags: <defaults>
</compile_context>

<pallas_src>
import functools

import numpy as np

import jax
import jax.numpy as jnp
from jax.experimental import pallas as pl
from jax.experimental.pallas import tpu as pltpu


def _block_kernel(x_ref, t1_ref, t2_ref, gb_ref, out_ref, *, h_img, feat, inv_m):
    """Fused (Conv3x3 + BN + ReLU) x2 on a lane-dense (N*H, W*F) slab.

    x_ref  : (N*H, W*Cin)    f32  dense layer-1 input rows.
    t1_ref : (W*Cin, 3*W*F)  f32  conv1 banded row-Toeplitz weights, 3 vertical taps
                                  concatenated along columns ([tap -1 | tap 0 | tap +1]).
    t2_ref : (W*F, 3*W*F)    f32  conv2 weights, same tap-concatenated layout.
    gb_ref : (4, W*F)        f32  rows = [gamma1, beta1, gamma2, beta2], lane-tiled.
    out_ref: (N*H, W*F)      f32  lane-dense output slab.
    """
    nh, wf = out_ref.shape

    # Row masks for the vertical 'same' padding across the flattened (N*H) axis:
    # the up-tap is invalid on the first row of each image, the down-tap on the last.
    row = jax.lax.broadcasted_iota(jnp.int32, (nh, 1), 0)
    not_top = (row % h_img) != 0
    not_bot = (row % h_img) != (h_img - 1)

    def combine_taps(panels):
        # panels = [p_up | p_mid | p_dn]; output row r = p_up[r-1] + p_mid[r] + p_dn[r+1]
        # (out-of-image rows masked to zero).  Shifts are a one-row sublane move on
        # in-register values; no VMEM scratch, no reload.
        p_up = panels[:, 0:wf]
        p_mid = panels[:, wf:2 * wf]
        p_dn = panels[:, 2 * wf:3 * wf]
        up = jnp.where(not_top, jnp.concatenate([p_up[:1], p_up[:-1]], axis=0), 0.0)
        dn = jnp.where(not_bot, jnp.concatenate([p_dn[1:], p_dn[-1:]], axis=0), 0.0)
        return up + p_mid + dn

    def pool_channels(v):
        # (1, W*F) row -> per-channel sum over the W lane groups, replicated per group
        # (exactly the tiled layout scale/shift need).  log2(W) lane rolls on the XLU;
        # since 128 lanes == W*F, the wraparound stays within the channel.
        s = feat
        while s < wf:
            v = v + pltpu.roll(v, shift=s, axis=1)
            s *= 2
        return v

    def bn_relu(acc, gamma, beta):
        # Training-mode BN folded to one scale/shift.  Rows reduced first (cheap
        # sublane reduce), then channels pooled with the roll tree -- no MXU pooling
        # matmuls.  Conv bias omitted: BN's mean subtraction cancels it exactly.
        rsum = jnp.sum(acc, axis=0, keepdims=True)
        rsumsq = jnp.sum(acc * acc, axis=0, keepdims=True)
        mean = pool_channels(rsum) * inv_m                      # (1, W*F)
        var = pool_channels(rsumsq) * inv_m - mean * mean       # one-pass E[x^2]-E[x]^2
        scale = gamma * jax.lax.rsqrt(var + 1e-5)
        shift = beta - mean * scale
        return jnp.maximum(acc * scale + shift, 0.0)

    # ---- layer 1: one wide banded-Toeplitz MXU matmul (K=W*Cin, N=3*W*F) ----
    p1 = jnp.dot(x_ref[...], t1_ref[...], preferred_element_type=jnp.float32)
    h = bn_relu(combine_taps(p1), gb_ref[0:1, :], gb_ref[1:2, :])

    # ---- layer 2: one wide matmul on the VMEM-resident intermediate ----
    p2 = jnp.dot(h, t2_ref[...], preferred_element_type=jnp.float32)
    out_ref[...] = bn_relu(combine_taps(p2), gb_ref[2:3, :], gb_ref[3:4, :])


def _conv_row_weights(w_hwio, width):
    """(3, 3, Cin, F) HWIO conv weights -> (3, width*Cin, width*F) banded row-Toeplitz
    matrices, one per vertical tap.  T[dy][u*Cin+c, w*F+f] = w_hwio[dy, u-w+1, c, f]
    inside the |u-w| <= 1 band and 0 outside (horizontal 'same' padding is implicit)."""
    kh, kw, cin, feat = w_hwio.shape
    off = (kw - 1) // 2
    sel = np.zeros((kw, width, width), np.float32)
    for dx in range(kw):
        for w in range(width):
            u = w + dx - off
            if 0 <= u < width:
                sel[dx, u, w] = 1.0
    t = jnp.einsum('dxcf,xuw->ducwf', w_hwio, jnp.asarray(sel),
                   precision=jax.lax.Precision.HIGHEST)
    return t.reshape(kh, width * cin, width * feat)


def fold_block_params(params, width):
    """One-time parameter folding, hoisted out of the per-call forward path."""
    t1 = _conv_row_weights(params["w1"], width)               # (3, W*Cin, W*F)
    t2 = _conv_row_weights(params["w2"], width)               # (3, W*F,  W*F)
    t1w = jnp.concatenate([t1[0], t1[1], t1[2]], axis=1)      # (W*Cin, 3*W*F)
    t2w = jnp.concatenate([t2[0], t2[1], t2[2]], axis=1)      # (W*F,  3*W*F)
    gb = jnp.stack([jnp.tile(params["g1"], width),
                    jnp.tile(params["be1"], width),
                    jnp.tile(params["g2"], width),
                    jnp.tile(params["be2"], width)], axis=0)  # (4, W*F)
    # NOTE: conv biases b1/b2 are intentionally NOT folded in: training-mode BatchNorm
    # subtracts the per-channel batch mean, which cancels a per-channel bias exactly.
    return {"t1w": t1w, "t2w": t2w, "gb": gb}


@jax.jit
def block_forward(x_nchw, folded):
    """Equivalent of Block.forward(input); input/output in PyTorch NCHW layout."""
    x = jnp.transpose(x_nchw, (0, 2, 3, 1))                   # NCHW -> NHWC
    n, h, w, cin = x.shape
    wf = folded["t1w"].shape[1] // 3
    feat = wf // w
    assert wf % 128 == 0, "W*F must be a multiple of 128 for lane-dense slabs"
    assert (w & (w - 1)) == 0, "W must be a power of two for the roll-add pooling tree"

    x_dense = x.reshape(n * h, w * cin)                       # dense layer-1 input slab

    vmem = pl.BlockSpec(memory_space=pltpu.MemorySpace.VMEM)
    out_dense = pl.pallas_call(
        functools.partial(_block_kernel, h_img=h, feat=feat,
                          inv_m=1.0 / float(n * h * w)),
        out_shape=jax.ShapeDtypeStruct((n * h, wf), jnp.float32),
        in_specs=[vmem, vmem, vmem, vmem],
        out_specs=vmem,
    )(x_dense, folded["t1w"], folded["t2w"], folded["gb"])

    y = out_dense.reshape(n, h, w, feat)                      # dense slab -> NHWC
    return jnp.transpose(y, (0, 3, 1, 2))                     # NHWC -> NCHW


# ----------------------------- pure-JAX reference -----------------------------
def _ref_conv_bn_relu(x_nhwc, w_hwio, b, gamma, beta):
    y = jax.lax.conv_general_dilated(
        x_nhwc, w_hwio, window_strides=(1, 1), padding="SAME",
        dimension_numbers=("NHWC", "HWIO", "NHWC")) + b
    mean = y.mean(axis=(0, 1, 2))
    var = ((y - mean) ** 2).mean(axis=(0, 1, 2))
    y = (y - mean) / jnp.sqrt(var + 1e-5) * gamma + beta
    return jnp.maximum(y, 0.0)


def _ref_block_forward(x_nchw, params):
    x = jnp.transpose(x_nchw, (0, 2, 3, 1))
    h = _ref_conv_bn_relu(x, params["w1"], params["b1"], params["g1"], params["be1"])
    y = _ref_conv_bn_relu(h, params["w2"], params["b2"], params["g2"], params["be2"])
    return jnp.transpose(y, (0, 3, 1, 2))


# ----------------------------------- main -------------------------------------
if __name__ == "__main__":
    # Small shapes consistent with Block(in_channels=4, features=8)
    N, Cin, H, W = 2, 4, 16, 16
    F = 8

    key = jax.random.PRNGKey(0)
    k = jax.random.split(key, 9)

    # Conv weights created in PyTorch OIHW convention, transposed to HWIO.
    w1_oihw = 0.1 * jax.random.normal(k[0], (F, Cin, 3, 3), jnp.float32)
    w2_oihw = 0.1 * jax.random.normal(k[1], (F, F, 3, 3), jnp.float32)
    params = {
        "w1": jnp.transpose(w1_oihw, (2, 3, 1, 0)),            # (3,3,Cin,F)
        "b1": 0.05 * jax.random.normal(k[2], (F,), jnp.float32),
        "g1": 1.0 + 0.1 * jax.random.normal(k[3], (F,), jnp.float32),
        "be1": 0.1 * jax.random.normal(k[4], (F,), jnp.float32),
        "w2": jnp.transpose(w2_oihw, (2, 3, 1, 0)),            # (3,3,F,F)
        "b2": 0.05 * jax.random.normal(k[5], (F,), jnp.float32),
        "g2": 1.0 + 0.1 * jax.random.normal(k[6], (F,), jnp.float32),
        "be2": 0.1 * jax.random.normal(k[7], (F,), jnp.float32),
    }

    x = jax.random.normal(k[8], (N, Cin, H, W), jnp.float32)   # PyTorch NCHW input

    folded = fold_block_params(params, W)                      # one-time weight prep
    folded = jax.tree_util.tree_map(jax.block_until_ready, folded)

    out = block_forward(x, folded)
    out = jax.block_until_ready(out)
    assert out.shape == (N, F, H, W), out.shape

    ref = _ref_block_forward(x, params)
    assert jnp.allclose(out, ref, rtol=1e-4, atol=2e-4), (
        float(jnp.max(jnp.abs(out - ref))))

    print("KERNEL_OK")
</pallas_src>

<mosaic_0001>
module attributes {stable_mosaic.version = 11 : i64} {
  func.func @_block_kernel(%arg0: memref<32x64xf32, #tpu.memory_space<vmem>>, %arg1: memref<64x384xf32, #tpu.memory_space<vmem>>, %arg2: memref<128x384xf32, #tpu.memory_space<vmem>>, %arg3: memref<4x128xf32, #tpu.memory_space<vmem>>, %arg4: memref<32x128xf32, #tpu.memory_space<vmem>>) attributes {dimension_semantics = [], scalar_prefetch = 0 : i64, scratch_operands = 0 : i64, tpu.core_type = #tpu.core_type<tc>} {
    %0 = tpu.iota {dimensions = array<i32: 0>} : vector<32x1xi32>
    %c16_i32 = arith.constant 16 : i32
    %c0_i32 = arith.constant 0 : i32
    %1 = arith.cmpi eq, %c16_i32, %c0_i32 : i32
    %c1_i32 = arith.constant 1 : i32
    %2 = arith.select %1, %c1_i32, %c16_i32 : i32
    %3 = vector.broadcast %2 : i32 to vector<32x1xi32>
    %4 = arith.remsi %0, %3 : vector<32x1xi32>
    %c0_i32_0 = arith.constant 0 : i32
    %5 = vector.broadcast %c0_i32_0 : i32 to vector<32x1xi32>
    %6 = arith.cmpi ne, %4, %5 : vector<32x1xi32>
    %c0_i32_1 = arith.constant 0 : i32
    %7 = vector.broadcast %c0_i32_1 : i32 to vector<32x1xi32>
    %8 = arith.cmpi slt, %4, %7 : vector<32x1xi32>
    %c0_i32_2 = arith.constant 0 : i32
    %9 = arith.cmpi slt, %2, %c0_i32_2 : i32
    %10 = vector.broadcast %9 : i1 to vector<32x1xi1>
    %11 = vector.broadcast %10 : vector<32x1xi1> to vector<32x1xi1>
    %12 = arith.xori %8, %11 : vector<32x1xi1>
    %13 = arith.andi %12, %6 : vector<32x1xi1>
    %14 = vector.broadcast %2 : i32 to vector<32x1xi32>
    %15 = arith.addi %4, %14 : vector<32x1xi32>
    %16 = arith.select %13, %15, %4 : vector<32x1xi1>, vector<32x1xi32>
    %c0_i32_3 = arith.constant 0 : i32
    %17 = vector.broadcast %c0_i32_3 : i32 to vector<32x1xi32>
    %18 = arith.cmpi ne, %16, %17 : vector<32x1xi32>
    %c16_i32_4 = arith.constant 16 : i32
    %c0_i32_5 = arith.constant 0 : i32
    %19 = arith.cmpi eq, %c16_i32_4, %c0_i32_5 : i32
    %c1_i32_6 = arith.constant 1 : i32
    %20 = arith.select %19, %c1_i32_6, %c16_i32_4 : i32
    %21 = vector.broadcast %20 : i32 to vector<32x1xi32>
    %22 = arith.remsi %0, %21 : vector<32x1xi32>
    %c0_i32_7 = arith.constant 0 : i32
    %23 = vector.broadcast %c0_i32_7 : i32 to vector<32x1xi32>
    %24 = arith.cmpi ne, %22, %23 : vector<32x1xi32>
    %c0_i32_8 = arith.constant 0 : i32
    %25 = vector.broadcast %c0_i32_8 : i32 to vector<32x1xi32>
    %26 = arith.cmpi slt, %22, %25 : vector<32x1xi32>
    %c0_i32_9 = arith.constant 0 : i32
    %27 = arith.cmpi slt, %20, %c0_i32_9 : i32
    %28 = vector.broadcast %27 : i1 to vector<32x1xi1>
    %29 = vector.broadcast %28 : vector<32x1xi1> to vector<32x1xi1>
    %30 = arith.xori %26, %29 : vector<32x1xi1>
    %31 = arith.andi %30, %24 : vector<32x1xi1>
    %32 = vector.broadcast %20 : i32 to vector<32x1xi32>
    %33 = arith.addi %22, %32 : vector<32x1xi32>
    %34 = arith.select %31, %33, %22 : vector<32x1xi1>, vector<32x1xi32>
    %c15_i32 = arith.constant 15 : i32
    %35 = vector.broadcast %c15_i32 : i32 to vector<32x1xi32>
    %36 = arith.cmpi ne, %34, %35 : vector<32x1xi32>
    %c0 = arith.constant 0 : index
    %c0_10 = arith.constant 0 : index
    %37 = vector.load %arg0[%c0, %c0_10] : memref<32x64xf32, #tpu.memory_space<vmem>>, vector<32x64xf32>
    %c0_11 = arith.constant 0 : index
    %c0_12 = arith.constant 0 : index
    %38 = vector.load %arg1[%c0_11, %c0_12] : memref<64x384xf32, #tpu.memory_space<vmem>>, vector<64x384xf32>
    %cst = arith.constant dense<0.000000e+00> : vector<32x384xf32>
    %39 = tpu.matmul %37, %38, %cst {dimension_numbers = #tpu.dot_dimension_numbers<[1], [0], [0], [1], [0, 0, 1, 1], [], []>} : vector<32x64xf32>, vector<64x384xf32>, vector<32x384xf32> -> vector<32x384xf32>
    %40 = vector.extract_strided_slice %39 {offsets = [0, 0], sizes = [32, 128], strides = [1, 1]} : vector<32x384xf32> to vector<32x128xf32>
    %41 = vector.extract_strided_slice %39 {offsets = [0, 128], sizes = [32, 128], strides = [1, 1]} : vector<32x384xf32> to vector<32x128xf32>
    %42 = vector.extract_strided_slice %39 {offsets = [0, 256], sizes = [32, 128], strides = [1, 1]} : vector<32x384xf32> to vector<32x128xf32>
    %43 = vector.extract_strided_slice %40 {offsets = [0, 0], sizes = [1, 128], strides = [1, 1]} : vector<32x128xf32> to vector<1x128xf32>
    %44 = vector.extract_strided_slice %40 {offsets = [0, 0], sizes = [31, 128], strides = [1, 1]} : vector<32x128xf32> to vector<31x128xf32>
    %45 = tpu.concatenate %43, %44 in 0 : vector<1x128xf32>, vector<31x128xf32> -> vector<32x128xf32>
    %cst_13 = arith.constant 0.000000e+00 : f32
    %46 = vector.shape_cast %18 : vector<32x1xi1> to vector<32x1xi1>
    %47 = vector.broadcast %46 : vector<32x1xi1> to vector<32x128xi1>
    %48 = vector.broadcast %cst_13 : f32 to vector<32x128xf32>
    %49 = arith.select %47, %45, %48 : vector<32x128xi1>, vector<32x128xf32>
    %50 = vector.extract_strided_slice %42 {offsets = [1, 0], sizes = [31, 128], strides = [1, 1]} : vector<32x128xf32> to vector<31x128xf32>
    %51 = vector.extract_strided_slice %42 {offsets = [31, 0], sizes = [1, 128], strides = [1, 1]} : vector<32x128xf32> to vector<1x128xf32>
    %52 = tpu.concatenate %50, %51 in 0 : vector<31x128xf32>, vector<1x128xf32> -> vector<32x128xf32>
    %cst_14 = arith.constant 0.000000e+00 : f32
    %53 = vector.shape_cast %36 : vector<32x1xi1> to vector<32x1xi1>
    %54 = vector.broadcast %53 : vector<32x1xi1> to vector<32x128xi1>
    %55 = vector.broadcast %cst_14 : f32 to vector<32x128xf32>
    %56 = arith.select %54, %52, %55 : vector<32x128xi1>, vector<32x128xf32>
    %57 = arith.addf %49, %41 : vector<32x128xf32>
    %58 = arith.addf %57, %56 : vector<32x128xf32>
    %c0_15 = arith.constant 0 : index
    %c0_16 = arith.constant 0 : index
    %59 = vector.load %arg3[%c0_15, %c0_16] : memref<4x128xf32, #tpu.memory_space<vmem>>, vector<1x128xf32>
    %c1 = arith.constant 1 : index
    %c0_17 = arith.constant 0 : index
    %60 = vector.load %arg3[%c1, %c0_17] : memref<4x128xf32, #tpu.memory_space<vmem>>, vector<1x128xf32>
    %cst_18 = arith.constant dense<0.000000e+00> : vector<128xf32>
    %61 = vector.multi_reduction <add>, %58, %cst_18 [0] : vector<32x128xf32> to vector<128xf32>
    %62 = vector.shape_cast %61 : vector<128xf32> to vector<1x128xf32>
    %63 = arith.mulf %58, %58 : vector<32x128xf32>
    %cst_19 = arith.constant dense<0.000000e+00> : vector<128xf32>
    %64 = vector.multi_reduction <add>, %63, %cst_19 [0] : vector<32x128xf32> to vector<128xf32>
    %65 = vector.shape_cast %64 : vector<128xf32> to vector<1x128xf32>
    %c8_i32 = arith.constant 8 : i32
    %66 = tpu.dynamic_rotate %62 by %c8_i32 dim 1 : vector<1x128xf32>, i32 -> vector<1x128xf32>
    %67 = arith.addf %62, %66 : vector<1x128xf32>
    %c16_i32_20 = arith.constant 16 : i32
    %68 = tpu.dynamic_rotate %67 by %c16_i32_20 dim 1 : vector<1x128xf32>, i32 -> vector<1x128xf32>
    %69 = arith.addf %67, %68 : vector<1x128xf32>
    %c32_i32 = arith.constant 32 : i32
    %70 = tpu.dynamic_rotate %69 by %c32_i32 dim 1 : vector<1x128xf32>, i32 -> vector<1x128xf32>
    %71 = arith.addf %69, %70 : vector<1x128xf32>
    %c64_i32 = arith.constant 64 : i32
    %72 = tpu.dynamic_rotate %71 by %c64_i32 dim 1 : vector<1x128xf32>, i32 -> vector<1x128xf32>
    %73 = arith.addf %71, %72 : vector<1x128xf32>
    %cst_21 = arith.constant 0.001953125 : f32
    %74 = vector.broadcast %cst_21 : f32 to vector<1x128xf32>
    %75 = arith.mulf %73, %74 : vector<1x128xf32>
    %c8_i32_22 = arith.constant 8 : i32
    %76 = tpu.dynamic_rotate %65 by %c8_i32_22 dim 1 : vector<1x128xf32>, i32 -> vector<1x128xf32>
    %77 = arith.addf %65, %76 : vector<1x128xf32>
    %c16_i32_23 = arith.constant 16 : i32
    %78 = tpu.dynamic_rotate %77 by %c16_i32_23 dim 1 : vector<1x128xf32>, i32 -> vector<1x128xf32>
    %79 = arith.addf %77, %78 : vector<1x128xf32>
    %c32_i32_24 = arith.constant 32 : i32
    %80 = tpu.dynamic_rotate %79 by %c32_i32_24 dim 1 : vector<1x128xf32>, i32 -> vector<1x128xf32>
    %81 = arith.addf %79, %80 : vector<1x128xf32>
    %c64_i32_25 = arith.constant 64 : i32
    %82 = tpu.dynamic_rotate %81 by %c64_i32_25 dim 1 : vector<1x128xf32>, i32 -> vector<1x128xf32>
    %83 = arith.addf %81, %82 : vector<1x128xf32>
    %cst_26 = arith.constant 0.001953125 : f32
    %84 = vector.broadcast %cst_26 : f32 to vector<1x128xf32>
    %85 = arith.mulf %83, %84 : vector<1x128xf32>
    %86 = arith.mulf %75, %75 : vector<1x128xf32>
    %87 = arith.subf %85, %86 : vector<1x128xf32>
    %cst_27 = arith.constant 9.99999974E-6 : f32
    %88 = vector.broadcast %cst_27 : f32 to vector<1x128xf32>
    %89 = arith.addf %87, %88 : vector<1x128xf32>
    %90 = math.rsqrt %89 : vector<1x128xf32>
    %91 = arith.mulf %59, %90 : vector<1x128xf32>
    %92 = arith.mulf %75, %91 : vector<1x128xf32>
    %93 = arith.subf %60, %92 : vector<1x128xf32>
    %94 = vector.broadcast %91 : vector<1x128xf32> to vector<32x128xf32>
    %95 = arith.mulf %58, %94 : vector<32x128xf32>
    %96 = vector.broadcast %93 : vector<1x128xf32> to vector<32x128xf32>
    %97 = arith.addf %95, %96 : vector<32x128xf32>
    %cst_28 = arith.constant 0.000000e+00 : f32
    %98 = vector.broadcast %cst_28 : f32 to vector<32x128xf32>
    %99 = arith.maximumf %97, %98 : vector<32x128xf32>
    %c0_29 = arith.constant 0 : index
    %c0_30 = arith.constant 0 : index
    %100 = vector.load %arg2[%c0_29, %c0_30] : memref<128x384xf32, #tpu.memory_space<vmem>>, vector<128x384xf32>
    %cst_31 = arith.constant dense<0.000000e+00> : vector<32x384xf32>
    %101 = tpu.matmul %99, %100, %cst_31 {dimension_numbers = #tpu.dot_dimension_numbers<[1], [0], [0], [1], [0, 0, 1, 1], [], []>} : vector<32x128xf32>, vector<128x384xf32>, vector<32x384xf32> -> vector<32x384xf32>
    %102 = vector.extract_strided_slice %101 {offsets = [0, 0], sizes = [32, 128], strides = [1, 1]} : vector<32x384xf32> to vector<32x128xf32>
    %103 = vector.extract_strided_slice %101 {offsets = [0, 128], sizes = [32, 128], strides = [1, 1]} : vector<32x384xf32> to vector<32x128xf32>
    %104 = vector.extract_strided_slice %101 {offsets = [0, 256], sizes = [32, 128], strides = [1, 1]} : vector<32x384xf32> to vector<32x128xf32>
    %105 = vector.extract_strided_slice %102 {offsets = [0, 0], sizes = [1, 128], strides = [1, 1]} : vector<32x128xf32> to vector<1x128xf32>
    %106 = vector.extract_strided_slice %102 {offsets = [0, 0], sizes = [31, 128], strides = [1, 1]} : vector<32x128xf32> to vector<31x128xf32>
    %107 = tpu.concatenate %105, %106 in 0 : vector<1x128xf32>, vector<31x128xf32> -> vector<32x128xf32>
    %cst_32 = arith.constant 0.000000e+00 : f32
    %108 = vector.shape_cast %18 : vector<32x1xi1> to vector<32x1xi1>
    %109 = vector.broadcast %108 : vector<32x1xi1> to vector<32x128xi1>
    %110 = vector.broadcast %cst_32 : f32 to vector<32x128xf32>
    %111 = arith.select %109, %107, %110 : vector<32x128xi1>, vector<32x128xf32>
    %112 = vector.extract_strided_slice %104 {offsets = [1, 0], sizes = [31, 128], strides = [1, 1]} : vector<32x128xf32> to vector<31x128xf32>
    %113 = vector.extract_strided_slice %104 {offsets = [31, 0], sizes = [1, 128], strides = [1, 1]} : vector<32x128xf32> to vector<1x128xf32>
    %114 = tpu.concatenate %112, %113 in 0 : vector<31x128xf32>, vector<1x128xf32> -> vector<32x128xf32>
    %cst_33 = arith.constant 0.000000e+00 : f32
    %115 = vector.shape_cast %36 : vector<32x1xi1> to vector<32x1xi1>
    %116 = vector.broadcast %115 : vector<32x1xi1> to vector<32x128xi1>
    %117 = vector.broadcast %cst_33 : f32 to vector<32x128xf32>
    %118 = arith.select %116, %114, %117 : vector<32x128xi1>, vector<32x128xf32>
    %119 = arith.addf %111, %103 : vector<32x128xf32>
    %120 = arith.addf %119, %118 : vector<32x128xf32>
    %c2 = arith.constant 2 : index
    %c0_34 = arith.constant 0 : index
    %121 = vector.load %arg3[%c2, %c0_34] : memref<4x128xf32, #tpu.memory_space<vmem>>, vector<1x128xf32>
    %c3 = arith.constant 3 : index
    %c0_35 = arith.constant 0 : index
    %122 = vector.load %arg3[%c3, %c0_35] : memref<4x128xf32, #tpu.memory_space<vmem>>, vector<1x128xf32>
    %cst_36 = arith.constant dense<0.000000e+00> : vector<128xf32>
    %123 = vector.multi_reduction <add>, %120, %cst_36 [0] : vector<32x128xf32> to vector<128xf32>
    %124 = vector.shape_cast %123 : vector<128xf32> to vector<1x128xf32>
    %125 = arith.mulf %120, %120 : vector<32x128xf32>
    %cst_37 = arith.constant dense<0.000000e+00> : vector<128xf32>
    %126 = vector.multi_reduction <add>, %125, %cst_37 [0] : vector<32x128xf32> to vector<128xf32>
    %127 = vector.shape_cast %126 : vector<128xf32> to vector<1x128xf32>
    %c8_i32_38 = arith.constant 8 : i32
    %128 = tpu.dynamic_rotate %124 by %c8_i32_38 dim 1 : vector<1x128xf32>, i32 -> vector<1x128xf32>
    %129 = arith.addf %124, %128 : vector<1x128xf32>
    %c16_i32_39 = arith.constant 16 : i32
    %130 = tpu.dynamic_rotate %129 by %c16_i32_39 dim 1 : vector<1x128xf32>, i32 -> vector<1x128xf32>
    %131 = arith.addf %129, %130 : vector<1x128xf32>
    %c32_i32_40 = arith.constant 32 : i32
    %132 = tpu.dynamic_rotate %131 by %c32_i32_40 dim 1 : vector<1x128xf32>, i32 -> vector<1x128xf32>
    %133 = arith.addf %131, %132 : vector<1x128xf32>
    %c64_i32_41 = arith.constant 64 : i32
    %134 = tpu.dynamic_rotate %133 by %c64_i32_41 dim 1 : vector<1x128xf32>, i32 -> vector<1x128xf32>
    %135 = arith.addf %133, %134 : vector<1x128xf32>
    %cst_42 = arith.constant 0.001953125 : f32
    %136 = vector.broadcast %cst_42 : f32 to vector<1x128xf32>
    %137 = arith.mulf %135, %136 : vector<1x128xf32>
    %c8_i32_43 = arith.constant 8 : i32
    %138 = tpu.dynamic_rotate %127 by %c8_i32_43 dim 1 : vector<1x128xf32>, i32 -> vector<1x128xf32>
    %139 = arith.addf %127, %138 : vector<1x128xf32>
    %c16_i32_44 = arith.constant 16 : i32
    %140 = tpu.dynamic_rotate %139 by %c16_i32_44 dim 1 : vector<1x128xf32>, i32 -> vector<1x128xf32>
    %141 = arith.addf %139, %140 : vector<1x128xf32>
    %c32_i32_45 = arith.constant 32 : i32
    %142 = tpu.dynamic_rotate %141 by %c32_i32_45 dim 1 : vector<1x128xf32>, i32 -> vector<1x128xf32>
    %143 = arith.addf %141, %142 : vector<1x128xf32>
    %c64_i32_46 = arith.constant 64 : i32
    %144 = tpu.dynamic_rotate %143 by %c64_i32_46 dim 1 : vector<1x128xf32>, i32 -> vector<1x128xf32>
    %145 = arith.addf %143, %144 : vector<1x128xf32>
    %cst_47 = arith.constant 0.001953125 : f32
    %146 = vector.broadcast %cst_47 : f32 to vector<1x128xf32>
    %147 = arith.mulf %145, %146 : vector<1x128xf32>
    %148 = arith.mulf %137, %137 : vector<1x128xf32>
    %149 = arith.subf %147, %148 : vector<1x128xf32>
    %cst_48 = arith.constant 9.99999974E-6 : f32
    %150 = vector.broadcast %cst_48 : f32 to vector<1x128xf32>
    %151 = arith.addf %149, %150 : vector<1x128xf32>
    %152 = math.rsqrt %151 : vector<1x128xf32>
    %153 = arith.mulf %121, %152 : vector<1x128xf32>
    %154 = arith.mulf %137, %153 : vector<1x128xf32>
    %155 = arith.subf %122, %154 : vector<1x128xf32>
    %156 = vector.broadcast %153 : vector<1x128xf32> to vector<32x128xf32>
    %157 = arith.mulf %120, %156 : vector<32x128xf32>
    %158 = vector.broadcast %155 : vector<1x128xf32> to vector<32x128xf32>
    %159 = arith.addf %157, %158 : vector<32x128xf32>
    %cst_49 = arith.constant 0.000000e+00 : f32
    %160 = vector.broadcast %cst_49 : f32 to vector<32x128xf32>
    %161 = arith.maximumf %159, %160 : vector<32x128xf32>
    %c0_50 = arith.constant 0 : index
    %c0_51 = arith.constant 0 : index
    %162 = vector.load %arg4[%c0_50, %c0_51] : memref<32x128xf32, #tpu.memory_space<vmem>>, vector<32x128xf32>
    tpu.vector_store %arg4[%c0_50, %c0_51], %161 {strides = array<i32>} : memref<32x128xf32, #tpu.memory_space<vmem>>, vector<32x128xf32>,
    return
  }
}

</mosaic_0001>

<bundles_post_ra>
// kernel: block_forward.1
= control target key start
LH: loop header
LB: loop body
LE: loop exit
PB: predicated region body
PF: predicated region fallthrough
CT: control target
= control target key end

     0   :  { %9 = vsyncpa [#allocation3], 0  ;;  %s1038_s15 = smov [#allocation2]   ;;  %s1406_s0 = inlined_call_operand.vmem [shape: f32[32,64], index: 0, kind: input, shape index: {}]   ;;  %s1407_s1 = inlined_call_operand.hbm [shape: f32[64,384], index: 1, kind: input, shape index: {}]   ;;  %s1408_s2 = inlined_call_operand.vmem [shape: f32[128,384], index: 2, kind: input, shape index: {}]   ;;  %s1409_s3 = inlined_call_operand.vmem [shape: f32[4,128], index: 3, kind: input, shape index: {}]   ;;  %s1410_s4 = inlined_call_operand.vmem [shape: f32[32,128], index: 4, kind: output, shape index: {}]  }
   0x1   :  { %s17_s16 = sshll.u32 %s1038_s15, 4  ;;  %s1014_s19 = scalar_lea.hbm %s1407_s1, 3072  ;;  %s18_s16 = int_to_ptr.vmem [resolvable:$true] %s17_s16 }
   0x2   :  { %p1015_p0 = scmp.ne.s32.totalorder %s1407_s1, %s1014_s19  ;;  %p1018_p1 = scmp.lt.u32.totalorder %s1014_s19, %s1407_s1 }
   0x4   :  { %p1020_p2 = pnand %p1018_p1, %p1015_p0 }
   0x6   :  { %1023 = shalt.err (!%p1020_p2)
}
   0x7   :  { %s1024_s24 = scalar_lea.vmem %s18_s16, 3072  ;;  %p1029_p4 = scmp.lt.s32.totalorder %s18_s16, %s18_s16 }
   0x8   :  { %p1025_p3 = scmp.ne.s32.totalorder %s18_s16, %s1024_s24  ;;  %p1030_p5 = scmp.lt.s32.totalorder %s1024_s24, %s1024_s24 }
   0xa   :  { %p1031_p6 = por %p1030_p5, %p1029_p4 }
   0xc   :  { %p1032_p7 = pnand %p1031_p6, %p1025_p3 }
   0xe   :  { %1035 = shalt.err (!%p1032_p7)
}
   0xf   :  { %s1039_s25 = smov 384   ;;  %s1040_s26 = smov 24  }
  0x10   :  { %23 = dma.hbm_to_vmem [thread:$0]  %s1407_s1, 3072, %s18_s16, [#allocation3], %s1039_s25, %s1039_s25, %s1040_s26  }
  0x11   :  { %1036 = dma.done.wait [#allocation3], 3072  }
  0x12   :  { %1037 = vsyncadd [#allocation3], 4294964224  ;;  %v1041_v0 = vmov 0.0   ;;  %v97_v1 = vld [vmem:[#allocation2 + $0x8] sm:$0xff]  ;;  %v100_v2 = vld [vmem:[#allocation2 + $0x20] sm:$0xff]  ;;  %vm120_vm0 = vcmask 523264   ;;  %v31_v41 = vlaneseq }
  0x13   :  { %197 = vmatprep.mubr.f32.mxu0 %v1041_v0  ;;  %v98_v3 = vld [vmem:[#allocation2 + $0x10] sm:$0xff]  ;;  %v906_v4 = vpack.c.bf16 %v100_v2, %v97_v1  ;;  %v101_v5 = vld [vmem:[#allocation2 + $0x28] sm:$0xff]  ;;  %v96_v6 = vld [vmem:[#allocation2] sm:$0xff]  ;;  %vm311_vm1 = vcmask 1040384   ;;  %vm340_vm3 = vcmask 1046528   ;;  %s1043_s10 = smov 16  }
  0x14   :  { %v99_v7 = vld [vmem:[#allocation2 + $0x18] sm:$0xff]  ;;  %v922_v8 = vpack.c.bf16 %v101_v5, %v98_v3  ;;  %v106_v11 = vld [vmem:[#allocation2 + $0x50] sm:$0xff]  ;;  %v104_v12 = vld [vmem:[#allocation2 + $0x40] sm:$0xff]  ;;  %v1108_v42 = vshrl.u32 %v31_v41, 7  ;;  %s1044_s11 = smov 32   ;;  %s1045_s23 = smov 64  }
  0x15   :  { %v908_v9 = vpack.c.bf16 %v99_v7, %v96_v6  ;;  %v103_v10 = vld [vmem:[#allocation2 + $0x38] sm:$0xff]  ;;  %907 = vmatprep.subr.bf16.mxu0 %v906_v4  ;;  %v102_v15 = vld [vmem:[#allocation2 + $0x30] sm:$0xff]  ;;  %v105_v16 = vld [vmem:[#allocation2 + $0x48] sm:$0xff] }
  0x16   :  { %v910_v13 = vpack.c.bf16 %v106_v11, %v103_v10  ;;  %v107_v14 = vld [vmem:[#allocation2 + $0x58] sm:$0xff]  ;;  %923 = vmatprep.subr.bf16.mxu1 %v922_v8  ;;  %v912_v18 = vpack.c.bf16 %v105_v16, %v102_v15  ;;  %v109_v19 = vld [vmem:[#allocation2 + $0x68] sm:$0xff]  ;;  %v112_v20 = vld [vmem:[#allocation2 + $0x80] sm:$0xff]  ;;  %v40_v43 = vand.u32 15, %v1108_v42  ;;  %v33_v44 = vadd.s32 8, %v1108_v42 }
  0x17   :  { %909 = vmatpush1.bf16.msra.mxu0 %v908_v9  ;;  %v926_v17 = vpack.c.bf16 %v107_v14, %v104_v12  ;;  %v110_v21 = vld [vmem:[#allocation2 + $0x70] sm:$0xff]  ;;  %925 = vmatpush3.bf16.msra.mxu1 %v922_v8  ;;  %v914_v22 = vpack.c.bf16 %v112_v20, %v109_v19  ;;  %v113_v23 = vld [vmem:[#allocation2 + $0x88] sm:$0xff]  ;;  %v108_v24 = vld [vmem:[#allocation2 + $0x60] sm:$0xff]  ;;  %v34_v50 = vadd.s32 16, %v1108_v42  ;;  %v35_v1 = vadd.s32 24, %v1108_v42 }
  0x18   :  { %911 = vmatprep.subr.bf16.mxu0 %v910_v13  ;;  %v111_v25 = vld [vmem:[#allocation2 + $0x78] sm:$0xff]  ;;  %v930_v26 = vpack.c.bf16 %v113_v23, %v110_v21  ;;  %v118_v28 = vld [vmem:[#allocation2 + $0xb0] sm:$0xff]  ;;  %v116_v29 = vld [vmem:[#allocation2 + $0xa0] sm:$0xff]  ;;  %vm1112_vm2 = vcmp.ne.s32.totalorder %v40_v43, 0  ;;  %v47_v55 = vand.u32 15, %v33_v44 }
  0x19   :  { %927 = vmatprep.subr.bf16.mxu1 %v926_v17  ;;  %v115_v27 = vld [vmem:[#allocation2 + $0x98] sm:$0xff]  ;;  %v916_v31 = vpack.c.bf16 %v111_v25, %v108_v24  ;;  %v92_v32 = vld [vmem:[%s1406_s0] sm:$0xff]  ;;  %v114_v34 = vld [vmem:[#allocation2 + $0x90] sm:$0xff]  ;;  %v54_v63 = vand.u32 15, %v34_v50  ;;  %v61_v14 = vand.u32 15, %v35_v1 }
  0x1a   :  { %v119_v30 = vld [vmem:[#allocation2 + $0xb8] sm:$0xff]  ;;  %v918_v33 = vpack.c.bf16 %v118_v28, %v115_v27  ;;  %v117_v35 = vld [vmem:[#allocation2 + $0xa8] sm:$0xff]  ;;  %862 = vmatprep.mubr.msk.f32.mxu1 %vm120_vm0, %v92_v32  ;;  %v94_v39 = vld [vmem:[%s1406_s0 + $0x10] sm:$0xff]  ;;  %vm1125_vm4 = vcmp.ne.s32.totalorder %v47_v55, 15 }
  0x1b   :  { %913 = vmatpush1.bf16.msra.mxu0 %v912_v18  ;;  %929 = vmatpush3.bf16.msra.mxu1 %v926_v17  ;;  %v934_v36 = vpack.c.bf16 %v119_v30, %v116_v29  ;;  %v920_v37 = vpack.c.bf16 %v117_v35, %v114_v34  ;;  %v93_v38 = vld [vmem:[%s1406_s0 + $0x8] sm:$0xff]  ;;  %v95_v40 = vld [vmem:[%s1406_s0 + $0x18] sm:$0xff]  ;;  %vm1130_vm5 = vcmp.ne.s32.totalorder %v54_v63, 0  ;;  %vm1144_vm6 = vcmp.ne.s32.totalorder %v61_v14, 15  ;;  %s1042_s0 = smov 8   ;;  %v454_v1 = vld [vmem:[%s1408_s2 + $0x20] sm:$0xff] }
  0x1c   :  { %915 = vmatprep.subr.bf16.mxu0 %v914_v22  ;;  %931 = vmatprep.subr.bf16.mxu1 %v930_v26  ;;  %v451_v63 = vld [vmem:[%s1408_s2 + $0x8] sm:$0xff] }
  0x1f   :  { %917 = vmatpush1.bf16.msra.mxu0 %v916_v31  ;;  %933 = vmatpush3.bf16.msra.mxu1 %v930_v26 }
  0x20   :  { %919 = vmatprep.subr.bf16.mxu0 %v918_v33  ;;  %935 = vmatprep.subr.bf16.mxu1 %v934_v36 }
  0x23   :  { %921 = vmatpush1.bf16.msra.mxu0 %v920_v37  ;;  %937 = vmatpush3.bf16.msra.mxu1 %v934_v36 }
  0x26   :  { %806 = vmatmul.mubr.msk.f32.vlgmr.msra.gmra.mrb[0].mxu0 %vm120_vm0, %v92_v32  ;;  %863 = vmatmul.mubr.msk.f32.vlgmr.msra.gmra.mrb[0].mxu1 %vm120_vm0, %v93_v38 }
  0x27   :  { %203 = vmatprep.mubr.f32.mxu0 %v1041_v0  ;;  %865 = vmatprep.mubr.msk.f32.mxu1 %vm120_vm0, %v94_v39 }
  0x2a   :  { %807 = vmatmul.mubr.msk.f32.gmra.mrb[2].mxu0 %vm120_vm0, %v93_v38  ;;  %866 = vmatmul.mubr.msk.f32.gmra.mrb[2].mxu1 %vm120_vm0, %v95_v40 }
  0x2b   :  { %209 = vmatprep.mubr.f32.mxu0 %v1041_v0 }
  0x2e   :  { %808 = vmatmul.mubr.msk.f32.gmra.mrb[4].mxu0 %vm120_vm0, %v94_v39 }
  0x2f   :  { %215 = vmatprep.mubr.f32.mxu0 %v1041_v0 }
  0x32   :  { %809 = vmatmul.mubr.msk.f32.gmra.mrb[6].mxu0 %vm120_vm0, %v95_v40 }
  0x33   :  { %562 = vmatprep.mubr.f32.mxu0 %v1041_v0 }
  0xf9   :  { %v199_v45 = vpop.f32.mrb[0].mxu0  ;;  %v864_v49 = vpop.f32.mrb[0].mxu1 }
  0xfa   :  { %v312_v46 = vrot.slane %v199_v45, 7  ;;  %v201_v48 = vpop.f32.mrb[1].mxu0  ;;  %v342_v51 = vrot.slane %v864_v49, 1  ;;  %v288_v52 = vpop.f32.mrb[1].mxu1 }
  0xfb   :  { %v341_v54 = vrot.slane %v288_v52, 1 }
  0xfc   :  { %v323_v53 = vsel %vm311_vm1, %v199_v45, %v312_v46 }
  0xfd   :  { %v332_v56 = vsel %vm1112_vm2, %v323_v53, 0.0  ;;  %v205_v57 = vpop.f32.mrb[2].mxu0  ;;  %v343_v59 = vsel %vm340_vm3, %v341_v54, %v342_v51  ;;  %v867_v61 = vpop.f32.mrb[2].mxu1 }
  0xfe   :  { %v365_v58 = vadd.f32 %v332_v56, %v201_v48  ;;  %v313_v60 = vrot.slane %v205_v57, 7  ;;  %v207_v62 = vpop.f32.mrb[3].mxu0  ;;  %v298_v2 = vpop.f32.mrb[3].mxu1  ;;  %v346_v7 = vrot.slane %v867_v61, 1 }
  0xff   :  { %v344_v6 = vrot.slane %v298_v2, 1  ;;  %v938_v2 = vpack.c.bf16 %v454_v1, %v451_v63  ;;  %v482_v63 = vld [vmem:[%s1408_s2 + $0x100] sm:$0xff] }
 0x100   :  { %v1122_v3 = vadd.f32 %v365_v58, %v343_v59  ;;  %v314_v4 = vsel %vm311_vm1, %v312_v46, %v313_v60  ;;  %v352_v26 = vsel %vm340_vm3, %v346_v7, %v867_v61 }
 0x101   :  { %v366_v8 = vadd.f32 %v314_v4, %v207_v62  ;;  %v211_v9 = vpop.f32.mrb[4].mxu0  ;;  %v345_v10 = vsel %vm340_vm3, %v342_v51, %v344_v6  ;;  %v347_v16 = vsel %vm340_vm3, %v344_v6, %v346_v7  ;;  %v364_v32 = vsel %vm1144_vm6, %v352_v26, 0.0  ;;  %v450_v4 = vld [vmem:[%s1408_s2] sm:$0xff]  ;;  %v453_v6 = vld [vmem:[%s1408_s2 + $0x18] sm:$0xff]  ;;  %v452_v7 = vld [vmem:[%s1408_s2 + $0x10] sm:$0xff]  ;;  %939 = vmatprep.subr.bf16.mxu0 %v938_v2 }
 0x102   :  { %v315_v11 = vrot.slane %v211_v9, 7  ;;  %v213_v13 = vpop.f32.mrb[5].mxu0  ;;  %v362_v15 = vsel %vm1125_vm4, %v345_v10, 0.0  ;;  %v384_v27 = vmul.f32 %v1122_v3, %v1122_v3  ;;  %v455_v9 = vld [vmem:[%s1408_s2 + $0x28] sm:$0xff]  ;;  %v485_v2 = vld [vmem:[%s1408_s2 + $0x118] sm:$0xff] }
 0x103   :  { %v1137_v17 = vadd.f32 %v366_v8, %v362_v15  ;;  %v940_v8 = vpack.c.bf16 %v453_v6, %v450_v4  ;;  %v970_v10 = vpack.c.bf16 %v455_v9, %v452_v7  ;;  %v456_v15 = vld [vmem:[%s1408_s2 + $0x30] sm:$0xff]  ;;  %v990_v4 = vpack.c.bf16 %v485_v2, %v482_v63  ;;  %v487_v6 = vld [vmem:[%s1408_s2 + $0x128] sm:$0xff]  ;;  %v490_v7 = vld [vmem:[%s1408_s2 + $0x140] sm:$0xff] }
 0x104   :  { %v316_v18 = vsel %vm311_vm1, %v313_v60, %v315_v11  ;;  %v486_v9 = vld [vmem:[%s1408_s2 + $0x120] sm:$0xff] }
 0x105   :  { %v334_v19 = vsel %vm1130_vm5, %v316_v18, 0.0  ;;  %v217_v20 = vpop.f32.mrb[6].mxu0  ;;  %v385_v21 = vmul.f32 %v1137_v17, %v1137_v17  ;;  %v375_v29 = vadd.f32 %v1137_v17, %v1122_v3  ;;  %941 = vmatpush1.bf16.msra.mxu0 %v940_v8  ;;  %971 = vmatprep.subr.bf16.mxu1 %v970_v10  ;;  %v458_v18 = vld [vmem:[%s1408_s2 + $0x40] sm:$0xff]  ;;  %v962_v8 = vpack.c.bf16 %v490_v7, %v487_v6 }
 0x106   :  { %v367_v22 = vadd.f32 %v334_v19, %v213_v13  ;;  %v317_v23 = vrot.slane %v217_v20, 7  ;;  %v219_v24 = vpop.f32.mrb[7].mxu0  ;;  %v460_v13 = vld [vmem:[%s1408_s2 + $0x50] sm:$0xff]  ;;  %973 = vmatpush3.bf16.msra.mxu1 %v970_v10  ;;  %v461_v20 = vld [vmem:[%s1408_s2 + $0x58] sm:$0xff] }
 0x107   :  { %v388_v35 = vadd.f32 %v385_v21, %v384_v27  ;;  %v974_v21 = vpack.c.bf16 %v461_v20, %v458_v18  ;;  %v462_v27 = vld [vmem:[%s1408_s2 + $0x60] sm:$0xff]  ;;  %v489_v10 = vld [vmem:[%s1408_s2 + $0x138] sm:$0xff]  ;;  %v492_v20 = vld [vmem:[%s1408_s2 + $0x150] sm:$0xff] }
 0x108   :  { %v1151_v28 = vadd.f32 %v367_v22, %v347_v16  ;;  %v318_v30 = vsel %vm311_vm1, %v315_v11, %v317_v23  ;;  %v457_v11 = vld [vmem:[%s1408_s2 + $0x38] sm:$0xff]  ;;  %v459_v16 = vld [vmem:[%s1408_s2 + $0x48] sm:$0xff]  ;;  %v466_v23 = vld [vmem:[%s1408_s2 + $0x80] sm:$0xff] }
 0x109   :  { %v368_v31 = vadd.f32 %v318_v30, %v219_v24  ;;  %v942_v14 = vpack.c.bf16 %v460_v13, %v457_v11  ;;  %v944_v19 = vpack.c.bf16 %v459_v16, %v456_v15  ;;  %v463_v22 = vld [vmem:[%s1408_s2 + $0x68] sm:$0xff]  ;;  %975 = vmatprep.subr.bf16.mxu1 %v974_v21  ;;  %v464_v30 = vld [vmem:[%s1408_s2 + $0x70] sm:$0xff]  ;;  %v964_v13 = vpack.c.bf16 %v489_v10, %v486_v9  ;;  %v493_v15 = vld [vmem:[%s1408_s2 + $0x158] sm:$0xff] }
 0x10a   :  { %v376_v33 = vadd.f32 %v375_v29, %v1151_v28  ;;  %v386_v34 = vmul.f32 %v1151_v28, %v1151_v28  ;;  %v946_v26 = vpack.c.bf16 %v466_v23, %v463_v22  ;;  %v465_v29 = vld [vmem:[%s1408_s2 + $0x78] sm:$0xff]  ;;  %977 = vmatpush3.bf16.msra.mxu1 %v974_v21  ;;  %v488_v11 = vld [vmem:[%s1408_s2 + $0x130] sm:$0xff]  ;;  %v495_v21 = vld [vmem:[%s1408_s2 + $0x168] sm:$0xff] }
 0x10b   :  { %v1161_v36 = vadd.f32 %v368_v31, %v364_v32  ;;  %943 = vmatprep.subr.bf16.mxu0 %v942_v14  ;;  %v948_v32 = vpack.c.bf16 %v465_v29, %v462_v27  ;;  %v491_v14 = vld [vmem:[%s1408_s2 + $0x148] sm:$0xff]  ;;  %v496_v16 = vld [vmem:[%s1408_s2 + $0x170] sm:$0xff]  ;;  %v494_v22 = vld [vmem:[%s1408_s2 + $0x160] sm:$0xff]  ;;  %v968_v23 = vpack.c.bf16 %v495_v21, %v492_v20 }
 0x10c   :  { %v389_v37 = vadd.f32 %v388_v35, %v386_v34  ;;  %945 = vmatpush1.bf16.msra.mxu0 %v944_v19  ;;  %v469_v35 = vld [vmem:[%s1408_s2 + $0x98] sm:$0xff]  ;;  %v994_v18 = vpack.c.bf16 %v491_v14, %v488_v11  ;;  %v966_v19 = vpack.c.bf16 %v496_v16, %v493_v15 }
 0x10d   :  { %v377_v38 = vadd.f32 %v376_v33, %v1161_v36  ;;  %v387_v39 = vmul.f32 %v1161_v36, %v1161_v36  ;;  %v467_v33 = vld [vmem:[%s1408_s2 + $0x88] sm:$0xff]  ;;  %947 = vmatprep.subr.bf16.mxu0 %v946_v26 }
 0x10e   :  { %v978_v34 = vpack.c.bf16 %v467_v33, %v464_v30 }
 0x10f   :  { %v390_v40 = vadd.f32 %v389_v37, %v387_v39  ;;  %v378_v41 = vrot.slane %v377_v38, 4  ;;  %v472_v37 = vld [vmem:[%s1408_s2 + $0xb0] sm:$0xff] }
 0x110   :  { %949 = vmatpush1.bf16.msra.mxu0 %v948_v32  ;;  %979 = vmatprep.subr.bf16.mxu1 %v978_v34  ;;  %v950_v39 = vpack.c.bf16 %v472_v37, %v469_v35 }
 0x111   :  { %v379_v43 = vadd.f32 %v378_v41, %v377_v38  ;;  %v391_v44 = vrot.slane %v390_v40, 4  ;;  %v471_v41 = vld [vmem:[%s1408_s2 + $0xa8] sm:$0xff]  ;;  %981 = vmatpush3.bf16.msra.mxu1 %v978_v34 }
 0x112   :  { %951 = vmatprep.subr.bf16.mxu0 %v950_v39  ;;  %v373_v39 = vld [vmem:[%s1409_s3] sm:$0x1] }
 0x113   :  { %v380_v45 = vrot.slane %v379_v43, 2  ;;  %v392_v46 = vadd.f32 %v391_v44, %v390_v40  ;;  %v468_v40 = vld [vmem:[%s1408_s2 + $0x90] sm:$0xff] }
 0x115   :  { %v381_v48 = vadd.f32 %v380_v45, %v379_v43  ;;  %v393_v49 = vrot.slane %v392_v46, 2  ;;  %v470_v43 = vld [vmem:[%s1408_s2 + $0xa0] sm:$0xff]  ;;  %v952_v45 = vpack.c.bf16 %v471_v41, %v468_v40  ;;  %v1330_v40 = vsub.s32 0, %v1108_v42 }
 0x117   :  { %v382_v50 = vrot.slane %v381_v48, 1  ;;  %v394_v51 = vadd.f32 %v393_v49, %v392_v46  ;;  %v473_v46 = vld [vmem:[%s1408_s2 + $0xb8] sm:$0xff]  ;;  %953 = vmatpush1.bf16.msra.mxu0 %v952_v45  ;;  %v475_v49 = vld [vmem:[%s1408_s2 + $0xc8] sm:$0xff] }
 0x119   :  { %v383_v52 = vadd.f32 %v382_v50, %v381_v48  ;;  %v395_v53 = vrot.slane %v394_v51, 1  ;;  %v982_v48 = vpack.c.bf16 %v473_v46, %v470_v43  ;;  %v478_v50 = vld [vmem:[%s1408_s2 + $0xe0] sm:$0xff] }
 0x11b   :  { %397 = vrot.lane.b32.xlu0 %v383_v52, %s1042_s0  ;;  %v396_v54 = vadd.f32 %v395_v53, %v394_v51  ;;  %983 = vmatprep.subr.bf16.mxu1 %v982_v48  ;;  %v954_v51 = vpack.c.bf16 %v478_v50, %v475_v49  ;;  %v477_v53 = vld [vmem:[%s1408_s2 + $0xd8] sm:$0xff] }
 0x11c   :  { %985 = vmatpush3.bf16.msra.mxu1 %v982_v48 }
 0x11d   :  { %955 = vmatprep.subr.bf16.mxu0 %v954_v51 }
 0x11f   :  { %410 = vrot.lane.b32.xlu0 %v396_v54, %s1042_s0 }
 0x18d   :  { %v398_v55 = vpop.permute.xlu0 %397 }
 0x18e   :  { %v399_v56 = vadd.f32 %v398_v55, %v383_v52  ;;  %v474_v52 = vld [vmem:[%s1408_s2 + $0xc0] sm:$0xff] }
 0x18f   :  { %v956_v55 = vpack.c.bf16 %v477_v53, %v474_v52 }
 0x190   :  { %400 = vrot.lane.b32.xlu1 %v399_v56, %s1043_s10 }
 0x191   :  { %v411_v57 = vpop.permute.xlu0 %410  ;;  %957 = vmatpush1.bf16.msra.mxu0 %v956_v55 }
 0x192   :  { %v412_v58 = vadd.f32 %v411_v57, %v396_v54  ;;  %v476_v54 = vld [vmem:[%s1408_s2 + $0xd0] sm:$0xff] }
 0x194   :  { %413 = vrot.lane.b32.xlu1 %v412_v58, %s1043_s10 }
 0x202   :  { %v401_v59 = vpop.permute.xlu1 %400 }
 0x203   :  { %v402_v60 = vadd.f32 %v401_v59, %v399_v56  ;;  %v479_v56 = vld [vmem:[%s1408_s2 + $0xe8] sm:$0xff]  ;;  %v484_v59 = vld [vmem:[%s1408_s2 + $0x110] sm:$0xff] }
 0x204   :  { %v986_v57 = vpack.c.bf16 %v479_v56, %v476_v54 }
 0x205   :  { %403 = vrot.lane.b32.xlu0 %v402_v60, %s1044_s11 }
 0x206   :  { %v414_v61 = vpop.permute.xlu1 %413  ;;  %987 = vmatprep.subr.bf16.mxu1 %v986_v57 }
 0x207   :  { %v415_v62 = vadd.f32 %v414_v61, %v412_v58  ;;  %v481_v58 = vld [vmem:[%s1408_s2 + $0xf8] sm:$0xff]  ;;  %v480_v61 = vld [vmem:[%s1408_s2 + $0xf0] sm:$0xff]  ;;  %989 = vmatpush3.bf16.msra.mxu1 %v986_v57 }
 0x208   :  { %991 = vmatprep.subr.bf16.mxu1 %v990_v4 }
 0x209   :  { %416 = vrot.lane.b32.xlu1 %v415_v62, %s1044_s11 }
 0x20b   :  { %993 = vmatpush3.bf16.msra.mxu1 %v990_v4 }
 0x20c   :  { %995 = vmatprep.subr.bf16.mxu1 %v994_v18 }
 0x20f   :  { %997 = vmatpush3.bf16.msra.mxu1 %v994_v18 }
 0x277   :  { %v404_v24 = vpop.permute.xlu0 %403 }
 0x278   :  { %v1223_v31 = vadd.f32 %v404_v24, %v402_v60  ;;  %v958_v60 = vpack.c.bf16 %v484_v59, %v481_v58  ;;  %v497_v24 = vld [vmem:[%s1408_s2 + $0x178] sm:$0xff] }
 0x279   :  { %v998_v26 = vpack.c.bf16 %v497_v24, %v494_v22 }
 0x27a   :  { %406 = vrot.lane.b32.xlu0 %v1223_v31, %s1045_s23  ;;  %959 = vmatprep.subr.bf16.mxu0 %v958_v60 }
 0x27b   :  { %v417_v38 = vpop.permute.xlu1 %416  ;;  %999 = vmatprep.subr.bf16.mxu1 %v998_v26 }
 0x27c   :  { %v1245_v44 = vadd.f32 %v417_v38, %v415_v62  ;;  %v483_v62 = vld [vmem:[%s1408_s2 + $0x108] sm:$0xff]  ;;  %1001 = vmatpush3.bf16.msra.mxu1 %v998_v26 }
 0x27d   :  { %v960_v1 = vpack.c.bf16 %v483_v62, %v480_v61 }
 0x27e   :  { %419 = vrot.lane.b32.xlu1 %v1245_v44, %s1045_s23 }
 0x27f   :  { %961 = vmatpush1.bf16.msra.mxu0 %v960_v1 }
 0x280   :  { %963 = vmatprep.subr.bf16.mxu0 %v962_v8 }
 0x283   :  { %965 = vmatpush1.bf16.msra.mxu0 %v964_v13 }
 0x284   :  { %967 = vmatprep.subr.bf16.mxu0 %v966_v19 }
 0x287   :  { %969 = vmatpush1.bf16.msra.mxu0 %v968_v23 }
 0x2ec   :  { %v407_v27 = vpop.permute.xlu0 %406 }
 0x2ed   :  { %v408_v29 = vadd.f32 %v407_v27, %v1223_v31  ;;  %v374_v31 = vld [vmem:[%s1409_s3 + $0x1] sm:$0x1] }
 0x2ef   :  { %v409_v30 = vmul.f32 0.001953125, %v408_v29 }
 0x2f0   :  { %v420_v32 = vpop.permute.xlu1 %419 }
 0x2f1   :  { %v421_v33 = vadd.f32 %v420_v32, %v1245_v44  ;;  %v423_v34 = vmul.f32 %v409_v30, %v409_v30 }
 0x2f3   :  { %v422_v35 = vmul.f32 0.001953125, %v421_v33 }
 0x2f5   :  { %v424_v37 = vsub.f32 %v422_v35, %v423_v34 }
 0x2f7   :  { %v425_v38 = vadd.f32 1e-05, %v424_v37 }
 0x2f9   :  { %1010 = vrsqrt.f32 %v425_v38 }
 0x303   :  { %v1011_v41 = vpop.eup %1010 }
 0x304   :  { %v427_v43 = vmul.f32 %v1011_v41, %v373_v39 }
 0x306   :  { %v428_v45 = vmul.f32 %v427_v43, %v409_v30  ;;  %v433_v44 = vrot.slane %v427_v43, %v1330_v40 }
 0x308   :  { %v429_v46 = vsub.f32 %v374_v31, %v428_v45  ;;  %v434_v48 = vmul.f32 %v433_v44, %v1122_v3  ;;  %v435_v50 = vmul.f32 %v433_v44, %v1137_v17  ;;  %v436_v51 = vmul.f32 %v433_v44, %v1151_v28 }
 0x309   :  { %v437_v54 = vmul.f32 %v433_v44, %v1161_v36 }
 0x30a   :  { %v441_v49 = vrot.slane %v429_v46, %v1330_v40 }
 0x30c   :  { %v442_v42 = vadd.f32 %v441_v49, %v434_v48  ;;  %v443_v52 = vadd.f32 %v441_v49, %v435_v50  ;;  %v444_v53 = vadd.f32 %v441_v49, %v436_v51  ;;  %v445_v57 = vadd.f32 %v441_v49, %v437_v54 }
 0x30e   :  { %v446_v55 = vmax.f32 %v442_v42, 0.0  ;;  %v447_v56 = vmax.f32 %v443_v52, 0.0  ;;  %v448_v58 = vmax.f32 %v444_v53, 0.0  ;;  %v449_v3 = vmax.f32 %v445_v57, 0.0 }
 0x310   :  { %563 = vmatmul.mubr.f32.vlgmr.msra.gmra.mrb[8].mxu0 %v446_v55  ;;  %900 = vmatprep.mubr.f32.mxu1 %v446_v55 }
 0x311   :  { %901 = vmatmul.mubr.f32.vlgmr.msra.gmra.mrb[4].mxu1 %v447_v56  ;;  %568 = vmatprep.mubr.f32.mxu0 %v1041_v0 }
 0x312   :  { %903 = vmatprep.mubr.f32.mxu1 %v448_v58 }
 0x314   :  { %569 = vmatmul.mubr.f32.gmra.mrb[10].mxu0 %v447_v56 }
 0x315   :  { %904 = vmatmul.mubr.f32.gmra.mrb[6].mxu1 %v449_v3  ;;  %574 = vmatprep.mubr.f32.mxu0 %v1041_v0 }
 0x318   :  { %575 = vmatmul.mubr.f32.gmra.mrb[12].mxu0 %v448_v58 }
 0x319   :  { %580 = vmatprep.mubr.f32.mxu0 %v1041_v0 }
 0x31c   :  { %581 = vmatmul.mubr.f32.gmra.mrb[14].mxu0 %v449_v3 }
 0x3e3   :  { %v564_v17 = vpop.f32.mrb[8].mxu0 }
 0x3e4   :  { %v676_v28 = vrot.slane %v564_v17, 7  ;;  %v566_v36 = vpop.f32.mrb[9].mxu0  ;;  %v902_v59 = vpop.f32.mrb[4].mxu1 }
 0x3e5   :  { %v697_v60 = vrot.slane %v902_v59, 1  ;;  %v653_v61 = vpop.f32.mrb[5].mxu1 }
 0x3e6   :  { %v687_v62 = vsel %vm311_vm1, %v564_v17, %v676_v28  ;;  %v696_v63 = vrot.slane %v653_v61, 1 }
 0x3e7   :  { %v688_v1 = vsel %vm1112_vm2, %v687_v62, 0.0  ;;  %v570_v2 = vpop.f32.mrb[10].mxu0 }
 0x3e8   :  { %v712_v4 = vadd.f32 %v688_v1, %v566_v36  ;;  %v698_v6 = vsel %vm340_vm3, %v696_v63, %v697_v60  ;;  %v677_v7 = vrot.slane %v570_v2, 7  ;;  %v572_v8 = vpop.f32.mrb[11].mxu0  ;;  %v905_v0 = vpop.f32.mrb[6].mxu1 }
 0x3e9   :  { %v701_v9 = vrot.slane %v905_v0, 1  ;;  %v663_v10 = vpop.f32.mrb[7].mxu1 }
 0x3ea   :  { %v1348_v11 = vadd.f32 %v712_v4, %v698_v6  ;;  %v678_v13 = vsel %vm311_vm1, %v676_v28, %v677_v7  ;;  %v699_v14 = vrot.slane %v663_v10, 1 }
 0x3eb   :  { %v713_v15 = vadd.f32 %v678_v13, %v572_v8  ;;  %v576_v16 = vpop.f32.mrb[12].mxu0  ;;  %v707_v33 = vsel %vm340_vm3, %v701_v9, %v905_v0 }
 0x3ec   :  { %v700_v18 = vsel %vm340_vm3, %v697_v60, %v699_v14  ;;  %v679_v47 = vrot.slane %v576_v16, 7  ;;  %v578_v19 = vpop.f32.mrb[13].mxu0  ;;  %v702_v21 = vsel %vm340_vm3, %v699_v14, %v701_v9  ;;  %v731_v5 = vmul.f32 %v1348_v11, %v1348_v11  ;;  %v720_v16 = vld [vmem:[%s1409_s3 + $0x2] sm:$0x1] }
 0x3ed   :  { %v709_v20 = vsel %vm1125_vm4, %v700_v18, 0.0  ;;  %v711_v38 = vsel %vm1144_vm6, %v707_v33, 0.0 }
 0x3ee   :  { %v1355_v22 = vadd.f32 %v713_v15, %v709_v20  ;;  %v680_v23 = vsel %vm311_vm1, %v677_v7, %v679_v47 }
 0x3ef   :  { %v690_v24 = vsel %vm1130_vm5, %v680_v23, 0.0  ;;  %v582_v26 = vpop.f32.mrb[14].mxu0 }
 0x3f0   :  { %v732_v27 = vmul.f32 %v1355_v22, %v1355_v22  ;;  %v714_v29 = vadd.f32 %v690_v24, %v578_v19  ;;  %v681_v30 = vrot.slane %v582_v26, 7  ;;  %v584_v32 = vpop.f32.mrb[15].mxu0  ;;  %v722_v35 = vadd.f32 %v1355_v22, %v1348_v11  ;;  %v721_v19 = vld [vmem:[%s1409_s3 + $0x3] sm:$0x1] }
 0x3f2   :  { %v1365_v34 = vadd.f32 %v714_v29, %v702_v21  ;;  %v682_v12 = vsel %vm311_vm1, %v679_v47, %v681_v30  ;;  %v735_v43 = vadd.f32 %v732_v27, %v731_v5 }
 0x3f3   :  { %v715_v37 = vadd.f32 %v682_v12, %v584_v32 }
 0x3f4   :  { %v723_v39 = vadd.f32 %v722_v35, %v1365_v34  ;;  %v733_v41 = vmul.f32 %v1365_v34, %v1365_v34 }
 0x3f5   :  { %v719_v31 = vadd.f32 %v715_v37, %v711_v38 }
 0x3f6   :  { %v736_v45 = vadd.f32 %v735_v43, %v733_v41 }
 0x3f7   :  { %v724_v44 = vadd.f32 %v723_v39, %v719_v31  ;;  %v734_v46 = vmul.f32 %v719_v31, %v719_v31 }
 0x3f9   :  { %v725_v48 = vrot.slane %v724_v44, 4  ;;  %v737_v49 = vadd.f32 %v736_v45, %v734_v46 }
 0x3fb   :  { %v726_v50 = vadd.f32 %v725_v48, %v724_v44  ;;  %v738_v51 = vrot.slane %v737_v49, 4 }
 0x3fd   :  { %v727_v42 = vrot.slane %v726_v50, 2  ;;  %v739_v52 = vadd.f32 %v738_v51, %v737_v49 }
 0x3ff   :  { %v728_v53 = vadd.f32 %v727_v42, %v726_v50  ;;  %v740_v54 = vrot.slane %v739_v52, 2 }
 0x401   :  { %v729_v25 = vrot.slane %v728_v53, 1  ;;  %v741_v55 = vadd.f32 %v740_v54, %v739_v52 }
 0x403   :  { %v730_v56 = vadd.f32 %v729_v25, %v728_v53  ;;  %v742_v57 = vrot.slane %v741_v55, 1 }
 0x405   :  { %744 = vrot.lane.b32.xlu0 %v730_v56, %s1042_s0  ;;  %v743_v58 = vadd.f32 %v742_v57, %v741_v55 }
 0x407   :  { %757 = vrot.lane.b32.xlu1 %v743_v58, %s1042_s0 }
 0x477   :  { %v745_v3 = vpop.permute.xlu0 %744 }
 0x478   :  { %v746_v17 = vadd.f32 %v745_v3, %v730_v56 }
 0x479   :  { %v758_v28 = vpop.permute.xlu1 %757 }
 0x47a   :  { %v759_v36 = vadd.f32 %v758_v28, %v743_v58  ;;  %747 = vrot.lane.b32.xlu0 %v746_v17, %s1043_s10 }
 0x47c   :  { %760 = vrot.lane.b32.xlu1 %v759_v36, %s1043_s10 }
 0x4ec   :  { %v748_v59 = vpop.permute.xlu0 %747 }
 0x4ed   :  { %v749_v60 = vadd.f32 %v748_v59, %v746_v17 }
 0x4ee   :  { %v761_v61 = vpop.permute.xlu1 %760 }
 0x4ef   :  { %v762_v62 = vadd.f32 %v761_v61, %v759_v36  ;;  %750 = vrot.lane.b32.xlu0 %v749_v60, %s1044_s11 }
 0x4f1   :  { %763 = vrot.lane.b32.xlu1 %v762_v62, %s1044_s11 }
 0x561   :  { %v751_v63 = vpop.permute.xlu0 %750 }
 0x562   :  { %v752_v1 = vadd.f32 %v751_v63, %v749_v60 }
 0x563   :  { %v764_v2 = vpop.permute.xlu1 %763 }
 0x564   :  { %v765_v4 = vadd.f32 %v764_v2, %v762_v62  ;;  %753 = vrot.lane.b32.xlu0 %v752_v1, %s1045_s23 }
 0x566   :  { %766 = vrot.lane.b32.xlu1 %v765_v4, %s1045_s23 }
 0x5d6   :  { %v754_v6 = vpop.permute.xlu0 %753 }
 0x5d7   :  { %v755_v7 = vadd.f32 %v754_v6, %v752_v1 }
 0x5d8   :  { %v767_v8 = vpop.permute.xlu1 %766 }
 0x5d9   :  { %v756_v0 = vmul.f32 0.001953125, %v755_v7  ;;  %v768_v9 = vadd.f32 %v767_v8, %v765_v4 }
 0x5db   :  { %v770_v10 = vmul.f32 %v756_v0, %v756_v0  ;;  %v769_v13 = vmul.f32 0.001953125, %v768_v9 }
 0x5dd   :  { %v771_v14 = vsub.f32 %v769_v13, %v770_v10 }
 0x5df   :  { %v772_v15 = vadd.f32 1e-05, %v771_v14 }
 0x5e1   :  { %1012 = vrsqrt.f32 %v772_v15 }
 0x5eb   :  { %v1013_v18 = vpop.eup %1012 }
 0x5ec   :  { %v774_v47 = vmul.f32 %v1013_v18, %v720_v16 }
 0x5ee   :  { %v775_v20 = vmul.f32 %v774_v47, %v756_v0  ;;  %v780_v21 = vrot.slane %v774_v47, %v1330_v40 }
 0x5f0   :  { %v776_v23 = vsub.f32 %v721_v19, %v775_v20  ;;  %v781_v24 = vmul.f32 %v780_v21, %v1348_v11  ;;  %v782_v26 = vmul.f32 %v780_v21, %v1355_v22  ;;  %v783_v27 = vmul.f32 %v780_v21, %v1365_v34 }
 0x5f1   :  { %v784_v29 = vmul.f32 %v780_v21, %v719_v31 }
 0x5f2   :  { %v788_v30 = vrot.slane %v776_v23, %v1330_v40 }
 0x5f4   :  { %v789_v32 = vadd.f32 %v788_v30, %v781_v24  ;;  %v790_v33 = vadd.f32 %v788_v30, %v782_v26  ;;  %v791_v5 = vadd.f32 %v788_v30, %v783_v27  ;;  %v792_v35 = vadd.f32 %v788_v30, %v784_v29 }
 0x5f6   :  { %v793_v12 = vmax.f32 %v789_v32, 0.0  ;;  %v794_v37 = vmax.f32 %v790_v33, 0.0  ;;  %v795_v38 = vmax.f32 %v791_v5, 0.0  ;;  %v796_v39 = vmax.f32 %v792_v35, 0.0 }
 0x5f8   :  { %797 = vst [vmem:[%s1410_s4] sm:$0xff] %v793_v12  ;;  %798 = vst [vmem:[%s1410_s4 + $0x8] sm:$0xff] %v794_v37 }
 0x5f9   :  { %799 = vst [vmem:[%s1410_s4 + $0x10] sm:$0xff] %v795_v38  ;;  %800 = vst [vmem:[%s1410_s4 + $0x18] sm:$0xff] %v796_v39 }
 0x5fa   :  { %805 = vsyncpa [#allocation3], 1 }

</bundles_post_ra>
